<compile_context>
chip_gen: v5e
topology: v5e:2x2
jax: 0.10.0
libtpu: 0.0.40
codegen_flags: <defaults>
</compile_context>

<pallas_src>
import jax
import jax.numpy as jnp
from jax.experimental import pallas as pl
from jax.experimental.pallas import tpu as pltpu


def _round_up(v, m):
    return ((v + m - 1) // m) * m


def ppo_value_kernel(x_ref, w1_ref, b1_ref, w2_ref, b2_ref, out_ref):
    # Layer 1: in-kernel bf16 cast of x, MXU matmul with f32 accumulation,
    # bias + tanh in f32 (VPU/EUP; v5e has no bf16 VALU/EUP anyway).
    x = x_ref[...].astype(jnp.bfloat16)
    h = jnp.tanh(
        jnp.dot(x, w1_ref[...], preferred_element_type=jnp.float32) + b1_ref[...]
    )
    # Value head (H -> 1): VPU multiply + cross-lane (XLU) reduction, f32.
    # Narrow [tm, 1] store keeps output HBM traffic to 4 B/row.
    out_ref[...] = (
        jnp.sum(h * w2_ref[...], axis=-1, keepdims=True) + b2_ref[...]
    ).astype(out_ref.dtype)


def prepare_params(w1, b1, w2, b2):
    """One-time parameter prep (hoisted out of the per-call path).

    w1 : [E, H] -> bf16 (MXU RHS)
    b1 : [H]    -> f32 row [1, H]
    w2 : [H, 1] -> f32 row [1, H]  (value head used as a VPU reduce)
    b2 : [1]    -> f32 [1, 1]
    """
    H = w1.shape[1]
    return (
        w1.astype(jnp.bfloat16),
        b1.reshape(1, H).astype(jnp.float32),
        w2.reshape(1, H).astype(jnp.float32),
        b2.reshape(1, 1).astype(jnp.float32),
    )


def ppo_value_forward(x, w1_b, b1_row, w2_row, b2_sc, *, block_m=1024):
    """Fused value-network forward.

    x      : [B, E] float32
    w1_b   : [E, H] bfloat16       (from prepare_params)
    b1_row : [1, H] float32
    w2_row : [1, H] float32
    b2_sc  : [1, 1] float32
    returns values [B, 1] float32
    """
    B, E = x.shape
    H = w1_b.shape[1]

    # Batch tile: multiple of 8 sublanes, capped at block_m.  If there are
    # enough rows for two tiles, cap tm so the grid has >= 2 steps (one per
    # TensorCore on v7x under the "parallel" annotation).
    b8 = _round_up(B, 8)
    tm = min(block_m, b8)
    if b8 >= 16:
        tm = min(tm, _round_up(-(-b8 // 2), 8))
    grid = (pl.cdiv(B, tm),)  # ragged last block handled by the pipeline

    cost = pl.CostEstimate(
        flops=2 * B * E * H + 2 * B * H,
        transcendentals=B * H,
        bytes_accessed=(x.size * 4 + w1_b.size * 2
                        + (b1_row.size + w2_row.size + b2_sc.size) * 4
                        + B * 4),
    )

    return pl.pallas_call(
        ppo_value_kernel,
        out_shape=jax.ShapeDtypeStruct((B, 1), jnp.float32),
        grid_spec=pltpu.PrefetchScalarGridSpec(
            num_scalar_prefetch=0,
            grid=grid,
            in_specs=[
                pl.BlockSpec((tm, E), lambda i: (i, 0)),   # x tile per step (f32)
                pl.BlockSpec((E, H), lambda i: (0, 0)),    # W1 resident (bf16)
                pl.BlockSpec((1, H), lambda i: (0, 0)),    # b1 resident
                pl.BlockSpec((1, H), lambda i: (0, 0)),    # w2 row resident
                pl.BlockSpec((1, 1), lambda i: (0, 0)),    # b2 resident
            ],
            out_specs=pl.BlockSpec((tm, 1), lambda i: (i, 0)),
        ),
        compiler_params=pltpu.CompilerParams(
            dimension_semantics=("parallel",),   # megacore on v7x; no-op v5e/v6e
            vmem_limit_bytes=32 * 1024 * 1024,   # tiny buffers; fine on all gens
        ),
        cost_estimate=cost,
    )(x, w1_b, b1_row, w2_row, b2_sc)


def init_params(key, embedding_dim, hidden_dim):
    """Deterministic parameter init (mimics nn.Linear uniform fan-in init)."""
    k1, k2, k3, k4 = jax.random.split(key, 4)
    lim1 = 1.0 / jnp.sqrt(embedding_dim)
    lim2 = 1.0 / jnp.sqrt(hidden_dim)
    w1 = jax.random.uniform(k1, (embedding_dim, hidden_dim), jnp.float32, -lim1, lim1)
    b1 = jax.random.uniform(k2, (hidden_dim,), jnp.float32, -lim1, lim1)
    w2 = jax.random.uniform(k3, (hidden_dim, 1), jnp.float32, -lim2, lim2)
    b2 = jax.random.uniform(k4, (1,), jnp.float32, -lim2, lim2)
    return w1, b1, w2, b2


if __name__ == "__main__":
    # Small shapes consistent with the module: batch=2, embedding_dim=32,
    # hidden_dims=[256], output dim = 1 (state value).
    B, E, H = 2, 32, 256

    key = jax.random.PRNGKey(0)
    kx, kp = jax.random.split(key)
    x = jax.random.normal(kx, (B, E), dtype=jnp.float32)
    w1, b1, w2, b2 = init_params(kp, E, H)

    # One-time weight prep (would live with the train state in real use).
    w1_b, b1_row, w2_row, b2_sc = prepare_params(w1, b1, w2, b2)

    values = ppo_value_forward(x, w1_b, b1_row, w2_row, b2_sc)
    values = jax.block_until_ready(values)
    assert values.shape == (B, 1)

    # Reference with the same arithmetic as the kernel (bf16 first matmul,
    # f32 accumulation, f32 VPU value head).
    h_ref = jnp.tanh(
        jnp.dot(x.astype(jnp.bfloat16), w1.astype(jnp.bfloat16),
                preferred_element_type=jnp.float32) + b1.reshape(1, H))
    ref = jnp.sum(h_ref * w2.reshape(1, H), axis=-1, keepdims=True) + b2.reshape(1, 1)
    assert jnp.allclose(values, ref, atol=1e-3, rtol=1e-3)

    # Sanity check against the pure-f32 PyTorch-equivalent forward (bf16 inputs
    # to the first matmul introduce only small error before the saturating tanh).
    ref_f32 = jnp.tanh(x @ w1 + b1.reshape(1, H)) @ w2 + b2.reshape(1, 1)
    assert jnp.allclose(values, ref_f32, atol=5e-2, rtol=5e-2)

    print("KERNEL_OK")
</pallas_src>

<mosaic_0001>
module attributes {stable_mosaic.version = 11 : i64} {
  func.func @ppo_value_kernel(%arg0: i32, %arg1: memref<8x32xf32, #tpu.memory_space<vmem>>, %arg2: memref<32x256xbf16, #tpu.memory_space<vmem>>, %arg3: memref<1x256xf32, #tpu.memory_space<vmem>>, %arg4: memref<1x256xf32, #tpu.memory_space<vmem>>, %arg5: memref<1x1xf32, #tpu.memory_space<vmem>>, %arg6: memref<8x1xf32, #tpu.memory_space<vmem>>) attributes {dimension_semantics = [#tpu.dimension_semantics<parallel>], iteration_bounds = array<i64: 1>, scalar_prefetch = 0 : i64, scratch_operands = 0 : i64, tpu.core_type = #tpu.core_type<tc>, window_params = [{transform_indices = @transform_0, window_bounds = array<i64: 8, 32>}, {pipeline_mode = #tpu.pipeline_mode<synchronous>, transform_indices = @transform_1, window_bounds = array<i64: 32, 256>}, {pipeline_mode = #tpu.pipeline_mode<synchronous>, transform_indices = @transform_2, window_bounds = array<i64: 1, 256>}, {pipeline_mode = #tpu.pipeline_mode<synchronous>, transform_indices = @transform_3, window_bounds = array<i64: 1, 256>}, {pipeline_mode = #tpu.pipeline_mode<synchronous>, transform_indices = @transform_4, window_bounds = array<i64: 1, 1>}, {transform_indices = @transform_5, window_bounds = array<i64: 8, 1>}]} {
    %c0 = arith.constant 0 : index
    %c0_0 = arith.constant 0 : index
    %0 = vector.load %arg1[%c0, %c0_0] : memref<8x32xf32, #tpu.memory_space<vmem>>, vector<8x32xf32>
    %1 = arith.truncf %0 : vector<8x32xf32> to vector<8x32xbf16>
    %c0_1 = arith.constant 0 : index
    %c0_2 = arith.constant 0 : index
    %2 = vector.load %arg2[%c0_1, %c0_2] : memref<32x256xbf16, #tpu.memory_space<vmem>>, vector<32x256xbf16>
    %cst = arith.constant dense<0.000000e+00> : vector<8x256xf32>
    %3 = tpu.matmul %1, %2, %cst {dimension_numbers = #tpu.dot_dimension_numbers<[1], [0], [0], [1], [0, 0, 1, 1], [], []>} : vector<8x32xbf16>, vector<32x256xbf16>, vector<8x256xf32> -> vector<8x256xf32>
    %c0_3 = arith.constant 0 : index
    %c0_4 = arith.constant 0 : index
    %4 = vector.load %arg3[%c0_3, %c0_4] : memref<1x256xf32, #tpu.memory_space<vmem>>, vector<1x256xf32>
    %5 = vector.broadcast %4 : vector<1x256xf32> to vector<8x256xf32>
    %6 = arith.addf %3, %5 : vector<8x256xf32>
    %7 = math.tanh %6 : vector<8x256xf32>
    %c0_5 = arith.constant 0 : index
    %c0_6 = arith.constant 0 : index
    %8 = vector.load %arg4[%c0_5, %c0_6] : memref<1x256xf32, #tpu.memory_space<vmem>>, vector<1x256xf32>
    %9 = vector.broadcast %8 : vector<1x256xf32> to vector<8x256xf32>
    %10 = arith.mulf %7, %9 : vector<8x256xf32>
    %cst_7 = arith.constant dense<0.000000e+00> : vector<8xf32>
    %11 = vector.multi_reduction <add>, %10, %cst_7 [1] : vector<8x256xf32> to vector<8xf32>
    %12 = vector.shape_cast %11 : vector<8xf32> to vector<8x1xf32>
    %c0_8 = arith.constant 0 : index
    %c0_9 = arith.constant 0 : index
    %13 = vector.load %arg5[%c0_8, %c0_9] : memref<1x1xf32, #tpu.memory_space<vmem>>, vector<1x1xf32>
    %14 = vector.broadcast %13 : vector<1x1xf32> to vector<8x1xf32>
    %15 = arith.addf %12, %14 : vector<8x1xf32>
    %c0_10 = arith.constant 0 : index
    %c0_11 = arith.constant 0 : index
    %16 = vector.load %arg6[%c0_10, %c0_11] : memref<8x1xf32, #tpu.memory_space<vmem>>, vector<8x1xf32>
    tpu.vector_store %arg6[%c0_10, %c0_11], %15 {strides = array<i32>} : memref<8x1xf32, #tpu.memory_space<vmem>>, vector<8x1xf32>,
    return
  }
  func.func @transform_0(%arg0: i32) -> (i32, i32) {
    %c0_i32 = arith.constant 0 : i32
    %c0_i32_0 = arith.constant 0 : i32
    return %arg0, %c0_i32 : i32, i32
  }
  func.func @transform_1(%arg0: i32) -> (i32, i32) {
    %c0_i32 = arith.constant 0 : i32
    %c0_i32_0 = arith.constant 0 : i32
    %c0_i32_1 = arith.constant 0 : i32
    return %c0_i32, %c0_i32_0 : i32, i32
  }
  func.func @transform_2(%arg0: i32) -> (i32, i32) {
    %c0_i32 = arith.constant 0 : i32
    %c0_i32_0 = arith.constant 0 : i32
    %c0_i32_1 = arith.constant 0 : i32
    return %c0_i32, %c0_i32_0 : i32, i32
  }
  func.func @transform_3(%arg0: i32) -> (i32, i32) {
    %c0_i32 = arith.constant 0 : i32
    %c0_i32_0 = arith.constant 0 : i32
    %c0_i32_1 = arith.constant 0 : i32
    return %c0_i32, %c0_i32_0 : i32, i32
  }
  func.func @transform_4(%arg0: i32) -> (i32, i32) {
    %c0_i32 = arith.constant 0 : i32
    %c0_i32_0 = arith.constant 0 : i32
    %c0_i32_1 = arith.constant 0 : i32
    return %c0_i32, %c0_i32_0 : i32, i32
  }
  func.func @transform_5(%arg0: i32) -> (i32, i32) {
    %c0_i32 = arith.constant 0 : i32
    %c0_i32_0 = arith.constant 0 : i32
    return %arg0, %c0_i32 : i32, i32
  }
}

</mosaic_0001>

<bundles_post_ra>
// kernel: tpu_custom_call.1
= control target key start
LH: loop header
LB: loop body
LE: loop exit
PB: predicated region body
PF: predicated region fallthrough
CT: control target
= control target key end

     0   :  { %s313_s0 = inlined_call_operand.vmem [shape: f32[2,32], index: 0, kind: input, shape index: {}]   ;;  %s314_s1 = inlined_call_operand.hbm [shape: bf16[32,256], index: 1, kind: input, shape index: {}]   ;;  %s315_s2 = inlined_call_operand.hbm [shape: f32[1,256], index: 2, kind: input, shape index: {}]   ;;  %s316_s3 = inlined_call_operand.vmem [shape: f32[1,256], index: 3, kind: input, shape index: {}]   ;;  %s317_s4 = inlined_call_operand.<no memory space> [shape: f32[1,1], index: 4, kind: input, shape index: {}]   ;;  %s318_s5 = inlined_call_operand.vmem [shape: f32[2,1], index: 5, kind: output, shape index: {}]  }
   0x1   :  { %v10_v0 = vstv %s317_s4 }
   0x2   :  { %11 = vst [vmem:[#allocation2] sm:$0x1] %v10_v0 }
   0x3   :  { %12 = vsyncpa [#allocation4], 0  ;;  %s20_s22 = sshll.u32 %s314_s1, 4  ;;  %s21_s22 = int_to_ptr.hbm [resolvable:$true] %s20_s22 }
   0x4   :  { %13 = vsyncpa [#allocation6], 0  ;;  %s261_s23 = smov [#allocation3]   ;;  %s34_s27 = sshll.u32 %s315_s2, 4  ;;  %s35_s27 = int_to_ptr.hbm [resolvable:$true] %s34_s27 }
   0x5   :  { %s22_s24 = sshll.u32 %s261_s23, 4  ;;  %s262_s28 = smov 128   ;;  %s23_s24 = int_to_ptr.vmem [resolvable:$true] %s22_s24 }
   0x6   :  { %s263_s29 = smov 8   ;;  %s264_s4 = smov [#allocation5]  }
   0x7   :  { %28 = dma.hbm_to_vmem [thread:$0]  %s21_s22, 512, %s23_s24, [#allocation4], %s262_s28, %s262_s28, %s263_s29  }
   0x8   :  { %s36_s30 = sshll.u32 %s264_s4, 4  ;;  %s37_s30 = int_to_ptr.vmem [resolvable:$true] %s36_s30 }
   0x9   :  { %39 = dma.hbm_to_vmem [thread:$0]  %s35_s27, 32, %s37_s30, [#allocation6]  }
   0xa   :  { %257 = dma.done.wait [#allocation4], 512  }
   0xb   :  { %258 = vsyncadd [#allocation4], 4294966784 }
   0xc   :  { %259 = dma.done.wait [#allocation6], 32  }
   0xd   :  { %260 = vsyncadd [#allocation6], 4294967264  ;;  %v188_v1 = vld [vmem:[#allocation3 + $0x10] sm:$0xf]  ;;  %v199_v2 = vld [vmem:[#allocation3 + $0x14] sm:$0xf0] }
   0xe   :  { %v198_v3 = vld [vmem:[#allocation3 + $0x14] sm:$0xf]  ;;  %v189_v4 = vor.u32 %v199_v2, %v188_v1  ;;  %v190_v5 = vld [vmem:[#allocation3 + $0x18] sm:$0xf0]  ;;  %v180_v6 = vld [vmem:[#allocation3] sm:$0xf] }
   0xf   :  { %v197_v7 = vld [vmem:[#allocation3 + $0x4] sm:$0xf0]  ;;  %v193_v8 = vor.u32 %v198_v3, %v190_v5  ;;  %v196_v9 = vld [vmem:[#allocation3 + $0x4] sm:$0xf]  ;;  %v182_v10 = vld [vmem:[#allocation3 + $0x8] sm:$0xf0] }
  0x10   :  { %95 = vmatpush.bf16.msra.mxu0 %v189_v4  ;;  %v181_v11 = vor.u32 %v197_v7, %v180_v6  ;;  %v53_v12 = vld [vmem:[%s313_s0] sm:$0xff]  ;;  %v185_v13 = vor.u32 %v196_v9, %v182_v10  ;;  %vm85_vm0 = vcmask 261120   ;;  %vm133_vm1 = vcmask 7168  }
  0x11   :  { %108 = vmatpush.bf16.msra.mxu1 %v193_v8  ;;  %v54_v14 = vpack.c.bf16 %v53_v12, %v53_v12  ;;  %v59_v15 = vld [vmem:[#allocation5] sm:$0x3]  ;;  %v204_v32 = vld [vmem:[#allocation2] ss:$0 sm:$0xff] }
  0x12   :  { %v61_v16 = vperm.slane %v59_v15, 0  ;;  %v62_v17 = vperm.slane %v59_v15, 1  ;;  %v117_v22 = vld [vmem:[%s316_s3] sm:$0x3] }
  0x13   :  { %v119_v23 = vperm.slane %v117_v22, 0  ;;  %v120_v24 = vperm.slane %v117_v22, 1 }
  0x14   :  { %96 = vmatpush.bf16.msra.mxu0 %v181_v11 }
  0x15   :  { %109 = vmatpush.bf16.msra.mxu1 %v185_v13 }
  0x17   :  { %194 = vmatmul.msk.bf16.vlgmr.msra.gmra.mxu0 %vm85_vm0, %v54_v14 }
  0x18   :  { %195 = vmatmul.msk.bf16.vlgmr.msra.gmra.mxu1 %vm85_vm0, %v54_v14 }
  0x94   :  { %v98_v18 = vpop.f32.mrf.mxu0 }
  0x95   :  { %v99_v19 = vadd.f32 %v98_v18, %v61_v16  ;;  %v111_v20 = vpop.f32.mrf.mxu1 }
  0x96   :  { %v112_v21 = vadd.f32 %v111_v20, %v62_v17 }
  0x97   :  { %205 = vtanh.f32 %v99_v19 }
  0x98   :  { %207 = vtanh.f32 %v112_v21 }
  0x9c   :  { %v100_v25 = vpop.f32.mrf.mxu0 }
  0x9d   :  { %v206_v26 = vpop.eup %205  ;;  %v113_v27 = vpop.f32.mrf.mxu1 }
  0x9e   :  { %v208_v28 = vpop.eup %207  ;;  %v123_v29 = vmul.f32 %v206_v26, %v119_v23 }
  0x9f   :  { %v124_v30 = vmul.f32 %v208_v28, %v120_v24 }
  0xa1   :  { %v125_v31 = vadd.f32 %v124_v30, %v123_v29 }
  0xa3   :  { %126 = vadd.xlane.f32.xlu0 %v125_v31 }
 0x116   :  { %v127_v33 = vpop.xlane.xlu0 %126 }
 0x117   :  { %v132_v34 = vadd.f32 %v204_v32, %v127_v33 }
 0x119   :  { %134 = vst.msk [vmem:[#allocation7] sm:$0xff] %vm133_vm1, %v132_v34 }
 0x120   :  { %v153_v35 = vld [vmem:[#allocation7] sm:$0x3] }
 0x121   :  { %154 = vst [vmem:[%s318_s5] sm:$0x3] %v153_v35 }
 0x122   :  { %172 = vsyncpa [#allocation4], 1 }
 0x123   :  { %173 = vsyncpa [#allocation6], 1 }

</bundles_post_ra>
